<compile_context>
chip_gen: v7x
topology: tpu7x:2x2x1
jax: 0.10.0
libtpu: 0.0.40
codegen_flags: <defaults>
</compile_context>

<pallas_src>
import functools

import jax
import jax.numpy as jnp
from jax.experimental import pallas as pl
from jax.experimental.pallas import tpu as pltpu

LANE = 128
SUBLANE = 8


def _round_up(x, m):
    return (x + m - 1) // m * m


def _pad2(a, rows, cols):
    r, c = a.shape
    if r == rows and c == cols:
        return a
    return jnp.pad(a, ((0, rows - r), (0, cols - c)))


def _vmem_budget_bytes():
    """~75% of physical VMEM (capped); safe on v5e/v6e (128 MiB) and v7x (64 MiB)."""
    try:
        cap = int(pltpu.get_tpu_info().vmem_capacity_bytes)
    except Exception:
        cap = 64 * 1024 * 1024
    return int(min(cap * 3 // 4, 96 * 1024 * 1024))


# --------------------------------------------------------------------------------------
# Pallas kernel: one SAGEConv layer (tiled A @ X_src reduction + fused epilogue)
# --------------------------------------------------------------------------------------
def _sage_layer_kernel(a_ref, xs_ref, xd_ref, wl_ref, wr_ref, b_ref, inv_ref,
                       o_ref, acc_ref, *, apply_relu, apply_log_softmax,
                       f_out_valid, compute_dtype):
    k = pl.program_id(1)

    @pl.when(k == 0)
    def _init():
        acc_ref[...] = jnp.zeros_like(acc_ref)

    # Aggregation partial sum: [tm, tk] @ [tk, Fin_pad] -> f32 [tm, Fin_pad]
    acc_ref[...] += jnp.dot(a_ref[...], xs_ref[...],
                            preferred_element_type=jnp.float32)

    @pl.when(k == pl.num_programs(1) - 1)
    def _finalize():
        # f32 per-row 1/deg turns the edge-count sum into the exact mean, then the
        # two epilogue matmuls run in compute_dtype on the MXU (no concat copy).
        agg = (acc_ref[...] * inv_ref[...]).astype(compute_dtype)
        out = jnp.dot(agg, wl_ref[...], preferred_element_type=jnp.float32)
        out = out + jnp.dot(xd_ref[...], wr_ref[...],
                            preferred_element_type=jnp.float32)
        out = out + b_ref[...]
        if apply_relu:
            out = jnp.maximum(out, 0.0)
        if apply_log_softmax:
            # Mask the zero-padded output lanes out of the softmax.
            cols = jax.lax.broadcasted_iota(jnp.int32, out.shape, 1)
            valid = cols < f_out_valid
            out = jnp.where(valid, out, -jnp.inf)
            m = jnp.max(out, axis=-1, keepdims=True)
            y = out - m
            lse = jnp.log(jnp.sum(jnp.exp(y), axis=-1, keepdims=True))
            out = jnp.where(valid, y - lse, 0.0)
        o_ref[...] = out.astype(o_ref.dtype)


def sage_layer(edge_index, n_src, n_dst, x_src, w_l_t, w_r_t, b, *,
               apply_relu, apply_log_softmax, out_channels,
               tm=512, tk=512, compute_dtype=jnp.bfloat16,
               out_dtype=jnp.float32):
    f_in_pad, f_out_pad = w_l_t.shape
    assert f_in_pad % LANE == 0 and f_out_pad % LANE == 0
    assert w_r_t.shape == (f_in_pad, f_out_pad)
    assert x_src.shape == (n_src, f_in_pad)

    c_bytes = jnp.dtype(compute_dtype).itemsize
    o_bytes = jnp.dtype(out_dtype).itemsize
    row_align = 16 if c_bytes == 2 else SUBLANE     # bf16 packed tile is (16, 128)
    budget = _vmem_budget_bytes()

    # ---- row tile -------------------------------------------------------------------
    tm = min(tm, _round_up(n_dst, row_align))
    # Give both v7x TensorCores work when the dst frontier is big enough.
    if _round_up(n_dst, tm) // tm < 2 and n_dst >= 512:
        tm = _round_up(_round_up(n_dst, row_align) // 2, row_align)

    # ---- k tile: make X_src fully resident when it comfortably fits ------------------
    ns_128 = _round_up(n_src, LANE)
    if ns_128 * f_in_pad * c_bytes <= budget // 4:
        tk = ns_128                                  # single k step; fetched once
    else:
        tk = min(tk, ns_128)

    def est(tm_, tk_):
        return (2 * tm_ * tk_ * c_bytes                    # A (double-buffered)
                + 2 * tk_ * f_in_pad * c_bytes             # X_src
                + 2 * tm_ * f_in_pad * c_bytes             # X_dst
                + 2 * 2 * f_in_pad * f_out_pad * c_bytes   # W_l^T, W_r^T
                + 2 * f_out_pad * 4                        # bias
                + 2 * tm_ * 4                              # 1/deg
                + 2 * tm_ * f_out_pad * o_bytes            # out
                + tm_ * f_in_pad * 4)                      # f32 acc scratch

    while est(tm, tk) > budget and tk > LANE:
        tk = max(LANE, _round_up(tk // 2, LANE))
    while est(tm, tk) > budget and tm > row_align:
        tm = max(row_align, _round_up(tm // 2, row_align))

    nd_pad = _round_up(n_dst, tm)
    ns_pad = _round_up(n_src, tk)

    # ---- build A (edge counts) directly at padded shape, in compute dtype ------------
    src, dst = edge_index[0], edge_index[1]
    a_p = jnp.zeros((nd_pad, ns_pad), compute_dtype).at[dst, src].add(
        jnp.ones(src.shape, compute_dtype))
    deg = jnp.zeros((nd_pad, 1), jnp.float32).at[dst, 0].add(1.0)
    inv_deg = 1.0 / jnp.maximum(deg, 1.0)                # f32, folded in at finalize

    xs_p = _pad2(x_src, ns_pad, f_in_pad).astype(compute_dtype)
    xd_p = _pad2(x_src[:n_dst], nd_pad, f_in_pad).astype(compute_dtype)
    wl_p = w_l_t.astype(compute_dtype)
    wr_p = w_r_t.astype(compute_dtype)
    b_p = b.astype(jnp.float32)

    grid = (nd_pad // tm, ns_pad // tk)

    out = pl.pallas_call(
        functools.partial(_sage_layer_kernel,
                          apply_relu=apply_relu,
                          apply_log_softmax=apply_log_softmax,
                          f_out_valid=out_channels,
                          compute_dtype=compute_dtype),
        out_shape=jax.ShapeDtypeStruct((nd_pad, f_out_pad), out_dtype),
        grid_spec=pltpu.PrefetchScalarGridSpec(
            num_scalar_prefetch=0,
            grid=grid,
            in_specs=[
                pl.BlockSpec((tm, tk), lambda i, k: (i, k)),               # A tile
                pl.BlockSpec((tk, f_in_pad), lambda i, k: (k, 0)),         # X_src tile
                pl.BlockSpec((tm, f_in_pad), lambda i, k: (i, 0)),         # X_dst rows
                pl.BlockSpec((f_in_pad, f_out_pad), lambda i, k: (0, 0)),  # W_l^T (resident)
                pl.BlockSpec((f_in_pad, f_out_pad), lambda i, k: (0, 0)),  # W_r^T (resident)
                pl.BlockSpec((1, f_out_pad), lambda i, k: (0, 0)),         # bias (resident)
                pl.BlockSpec((tm, 1), lambda i, k: (i, 0)),                # 1/deg (f32)
            ],
            out_specs=pl.BlockSpec((tm, f_out_pad), lambda i, k: (i, 0)),
            scratch_shapes=[pltpu.VMEM((tm, f_in_pad), jnp.float32)],
        ),
        compiler_params=pltpu.CompilerParams(
            dimension_semantics=("parallel", "arbitrary"),
            vmem_limit_bytes=budget,
        ),
    )(a_p, xs_p, xd_p, wl_p, wr_p, b_p, inv_deg)
    return out[:n_dst]  # feature dim stays lane-padded between layers


# --------------------------------------------------------------------------------------
# Glue (plain JAX): parameter init / packing, forward pass, reference
# --------------------------------------------------------------------------------------
def init_sage_params(key, in_channels, hidden_channels, out_channels, num_layers):
    """Deterministic glorot-uniform init of raw (W_l, W_r, b_l) per layer."""
    dims = [in_channels] + [hidden_channels] * (num_layers - 1) + [out_channels]
    raw = []
    for i in range(num_layers):
        f_in, f_out = dims[i], dims[i + 1]
        key, k1, k2 = jax.random.split(key, 3)
        lim = (6.0 / (f_in + f_out)) ** 0.5
        w_l = jax.random.uniform(k1, (f_out, f_in), jnp.float32, -lim, lim)
        w_r = jax.random.uniform(k2, (f_out, f_in), jnp.float32, -lim, lim)
        b_l = jnp.zeros((f_out,), jnp.float32)
        raw.append((w_l, w_r, b_l))
    return raw


def pack_sage_params(raw_params):
    """Pre-transpose + lane-pad per layer: (W_l^T, W_r^T [Fin_p, Fout_p], b [1, Fout_p], f_out)."""
    packed = []
    for w_l, w_r, b_l in raw_params:
        f_out, f_in = w_l.shape
        f_in_p, f_out_p = _round_up(f_in, LANE), _round_up(f_out, LANE)
        wl_t = _pad2(w_l.T, f_in_p, f_out_p)
        wr_t = _pad2(w_r.T, f_in_p, f_out_p)
        b = _pad2(b_l[None, :], 1, f_out_p)
        packed.append((wl_t, wr_t, b, f_out))
    return packed


def pyg_sage_model_forward(x, adjs, packed_params, *, compute_dtype=jnp.bfloat16):
    """adjs: list of (edge_index [2,E] int32, e_id (unused), size (n_src, n_dst))."""
    num_layers = len(packed_params)
    f_in0 = packed_params[0][0].shape[0]
    x = _pad2(x, x.shape[0], f_in0)                      # lane-pad features once
    for i, (edge_index, _, size) in enumerate(adjs):
        n_src, n_dst = int(size[0]), int(size[1])
        wl_t, wr_t, b, f_out = packed_params[i]
        last = i == num_layers - 1
        x = sage_layer(edge_index, n_src, n_dst, x, wl_t, wr_t, b,
                       apply_relu=not last, apply_log_softmax=last,
                       out_channels=f_out,
                       compute_dtype=compute_dtype,
                       out_dtype=jnp.float32 if last else compute_dtype)
        # dropout(p=0.5) in eval mode == identity (see TODO at top).
    return x[:, :packed_params[-1][3]]


def reference_forward(x, adjs, raw_params):
    """Plain-JAX reference of the PyTorch forward (eval mode)."""
    num_layers = len(raw_params)
    for i, (edge_index, _, size) in enumerate(adjs):
        n_src, n_dst = int(size[0]), int(size[1])
        src, dst = edge_index[0], edge_index[1]
        a = jnp.zeros((n_dst, n_src), jnp.float32).at[dst, src].add(1.0)
        a = a / jnp.maximum(jnp.sum(a, axis=1, keepdims=True), 1.0)
        x_t = x[:n_dst]
        w_l, w_r, b_l = raw_params[i]
        out = (a @ x) @ w_l.T + b_l[None, :] + x_t @ w_r.T
        if i != num_layers - 1:
            out = jnp.maximum(out, 0.0)
        x = out
    return jax.nn.log_softmax(x, axis=-1)


# --------------------------------------------------------------------------------------
# Demo
# --------------------------------------------------------------------------------------
if __name__ == "__main__":
    key = jax.random.PRNGKey(0)

    in_channels, hidden_channels, out_channels, num_layers = 16, 32, 8, 2
    n0, n1, n2 = 32, 16, 8  # layer 0: src=n0 -> dst=n1 ; layer 1: src=n1 -> dst=n2

    key, kx, ke0, ke1, kp = jax.random.split(key, 5)
    x = jax.random.normal(kx, (n0, in_channels), jnp.float32)

    # Random bipartite edge sets (src index in [0, n_src), dst index in [0, n_dst)).
    e0, e1 = 64, 32
    edge_index_0 = jnp.stack([
        jax.random.randint(ke0, (e0,), 0, n0, jnp.int32),
        jax.random.randint(jax.random.fold_in(ke0, 1), (e0,), 0, n1, jnp.int32),
    ])
    edge_index_1 = jnp.stack([
        jax.random.randint(ke1, (e1,), 0, n1, jnp.int32),
        jax.random.randint(jax.random.fold_in(ke1, 1), (e1,), 0, n2, jnp.int32),
    ])
    adjs = [
        (edge_index_0, None, (n0, n1)),
        (edge_index_1, None, (n1, n2)),
    ]

    raw_params = init_sage_params(kp, in_channels, hidden_channels, out_channels, num_layers)
    packed_params = pack_sage_params(raw_params)

    # Optimized (bf16 streams, f32 accumulation / normalization) and exact f32 paths.
    out_bf16 = pyg_sage_model_forward(x, adjs, packed_params, compute_dtype=jnp.bfloat16)
    out_f32 = pyg_sage_model_forward(x, adjs, packed_params, compute_dtype=jnp.float32)
    out_bf16, out_f32 = jax.block_until_ready((out_bf16, out_f32))

    assert out_bf16.shape == (n2, out_channels), out_bf16.shape
    assert out_f32.shape == (n2, out_channels), out_f32.shape
    # log-softmax rows must sum (in prob space) to 1
    assert bool(jnp.allclose(jnp.sum(jnp.exp(out_bf16), axis=-1), 1.0, atol=1e-4))
    assert bool(jnp.allclose(jnp.sum(jnp.exp(out_f32), axis=-1), 1.0, atol=1e-4))

    # Cross-check against a plain-JAX reference.
    with jax.default_matmul_precision("float32"):
        ref = reference_forward(x, adjs, raw_params)
    ref = jax.block_until_ready(ref)
    assert bool(jnp.allclose(out_f32, ref, atol=5e-2, rtol=5e-2))
    assert bool(jnp.allclose(out_bf16, ref, atol=1.5e-1, rtol=1.5e-1))

    print("KERNEL_OK")
</pallas_src>

<mosaic_0001>
module attributes {stable_mosaic.version = 11 : i64} {
  func.func @_sage_layer_kernel(%arg0: i32, %arg1: i32, %arg2: memref<16x128xbf16, #tpu.memory_space<vmem>>, %arg3: memref<128x128xbf16, #tpu.memory_space<vmem>>, %arg4: memref<16x128xbf16, #tpu.memory_space<vmem>>, %arg5: memref<128x128xbf16, #tpu.memory_space<vmem>>, %arg6: memref<128x128xbf16, #tpu.memory_space<vmem>>, %arg7: memref<1x128xf32, #tpu.memory_space<vmem>>, %arg8: memref<16x1xf32, #tpu.memory_space<vmem>>, %arg9: memref<16x128xbf16, #tpu.memory_space<vmem>>, %arg10: memref<16x128xf32, #tpu.memory_space<vmem>>) attributes {dimension_semantics = [#tpu.dimension_semantics<parallel>, #tpu.dimension_semantics<arbitrary>], iteration_bounds = array<i64: 1, 1>, scalar_prefetch = 0 : i64, scratch_operands = 1 : i64, tpu.core_type = #tpu.core_type<tc>, window_params = [{transform_indices = @transform_0, window_bounds = array<i64: 16, 128>}, {transform_indices = @transform_1, window_bounds = array<i64: 128, 128>}, {transform_indices = @transform_2, window_bounds = array<i64: 16, 128>}, {pipeline_mode = #tpu.pipeline_mode<synchronous>, transform_indices = @transform_3, window_bounds = array<i64: 128, 128>}, {pipeline_mode = #tpu.pipeline_mode<synchronous>, transform_indices = @transform_4, window_bounds = array<i64: 128, 128>}, {pipeline_mode = #tpu.pipeline_mode<synchronous>, transform_indices = @transform_5, window_bounds = array<i64: 1, 128>}, {transform_indices = @transform_6, window_bounds = array<i64: 16, 1>}, {transform_indices = @transform_7, window_bounds = array<i64: 16, 128>}]} {
    %c0_i32 = arith.constant 0 : i32
    %0 = arith.cmpi eq, %arg1, %c0_i32 : i32
    %1 = arith.extui %0 : i1 to i32
    %c0_i32_0 = arith.constant 0 : i32
    %2 = arith.cmpi ne, %1, %c0_i32_0 : i32
    scf.if %2 {
      %cst_10 = arith.constant 0.000000e+00 : f32
      %12 = vector.broadcast %cst_10 : f32 to vector<16x128xf32>
      %c0_11 = arith.constant 0 : index
      %c0_12 = arith.constant 0 : index
      %13 = vector.load %arg10[%c0_11, %c0_12] : memref<16x128xf32, #tpu.memory_space<vmem>>, vector<16x128xf32>
      tpu.vector_store %arg10[%c0_11, %c0_12], %12 {strides = array<i32>} : memref<16x128xf32, #tpu.memory_space<vmem>>, vector<16x128xf32>,
    } else {
    }
    %c0 = arith.constant 0 : index
    %c0_1 = arith.constant 0 : index
    %3 = vector.load %arg10[%c0, %c0_1] : memref<16x128xf32, #tpu.memory_space<vmem>>, vector<16x128xf32>
    %c0_2 = arith.constant 0 : index
    %c0_3 = arith.constant 0 : index
    %4 = vector.load %arg2[%c0_2, %c0_3] : memref<16x128xbf16, #tpu.memory_space<vmem>>, vector<16x128xbf16>
    %c0_4 = arith.constant 0 : index
    %c0_5 = arith.constant 0 : index
    %5 = vector.load %arg3[%c0_4, %c0_5] : memref<128x128xbf16, #tpu.memory_space<vmem>>, vector<128x128xbf16>
    %cst = arith.constant dense<0.000000e+00> : vector<16x128xf32>
    %6 = tpu.matmul %4, %5, %cst {dimension_numbers = #tpu.dot_dimension_numbers<[1], [0], [0], [1], [0, 0, 1, 1], [], []>} : vector<16x128xbf16>, vector<128x128xbf16>, vector<16x128xf32> -> vector<16x128xf32>
    %7 = arith.addf %3, %6 : vector<16x128xf32>
    %c0_6 = arith.constant 0 : index
    %c0_7 = arith.constant 0 : index
    %8 = vector.load %arg10[%c0_6, %c0_7] : memref<16x128xf32, #tpu.memory_space<vmem>>, vector<16x128xf32>
    tpu.vector_store %arg10[%c0_6, %c0_7], %7 {strides = array<i32>} : memref<16x128xf32, #tpu.memory_space<vmem>>, vector<16x128xf32>,
    %c0_i32_8 = arith.constant 0 : i32
    %9 = arith.cmpi eq, %arg1, %c0_i32_8 : i32
    %10 = arith.extui %9 : i1 to i32
    %c0_i32_9 = arith.constant 0 : i32
    %11 = arith.cmpi ne, %10, %c0_i32_9 : i32
    scf.if %11 {
      %c0_10 = arith.constant 0 : index
      %c0_11 = arith.constant 0 : index
      %12 = vector.load %arg10[%c0_10, %c0_11] : memref<16x128xf32, #tpu.memory_space<vmem>>, vector<16x128xf32>
      %c0_12 = arith.constant 0 : index
      %c0_13 = arith.constant 0 : index
      %13 = vector.load %arg8[%c0_12, %c0_13] : memref<16x1xf32, #tpu.memory_space<vmem>>, vector<16x1xf32>
      %14 = vector.broadcast %13 : vector<16x1xf32> to vector<16x128xf32>
      %15 = arith.mulf %12, %14 : vector<16x128xf32>
      %16 = arith.truncf %15 : vector<16x128xf32> to vector<16x128xbf16>
      %c0_14 = arith.constant 0 : index
      %c0_15 = arith.constant 0 : index
      %17 = vector.load %arg5[%c0_14, %c0_15] : memref<128x128xbf16, #tpu.memory_space<vmem>>, vector<128x128xbf16>
      %cst_16 = arith.constant dense<0.000000e+00> : vector<16x128xf32>
      %18 = tpu.matmul %16, %17, %cst_16 {dimension_numbers = #tpu.dot_dimension_numbers<[1], [0], [0], [1], [0, 0, 1, 1], [], []>} : vector<16x128xbf16>, vector<128x128xbf16>, vector<16x128xf32> -> vector<16x128xf32>
      %c0_17 = arith.constant 0 : index
      %c0_18 = arith.constant 0 : index
      %19 = vector.load %arg4[%c0_17, %c0_18] : memref<16x128xbf16, #tpu.memory_space<vmem>>, vector<16x128xbf16>
      %c0_19 = arith.constant 0 : index
      %c0_20 = arith.constant 0 : index
      %20 = vector.load %arg6[%c0_19, %c0_20] : memref<128x128xbf16, #tpu.memory_space<vmem>>, vector<128x128xbf16>
      %cst_21 = arith.constant dense<0.000000e+00> : vector<16x128xf32>
      %21 = tpu.matmul %19, %20, %cst_21 {dimension_numbers = #tpu.dot_dimension_numbers<[1], [0], [0], [1], [0, 0, 1, 1], [], []>} : vector<16x128xbf16>, vector<128x128xbf16>, vector<16x128xf32> -> vector<16x128xf32>
      %22 = arith.addf %18, %21 : vector<16x128xf32>
      %c0_22 = arith.constant 0 : index
      %c0_23 = arith.constant 0 : index
      %23 = vector.load %arg7[%c0_22, %c0_23] : memref<1x128xf32, #tpu.memory_space<vmem>>, vector<1x128xf32>
      %24 = vector.broadcast %23 : vector<1x128xf32> to vector<16x128xf32>
      %25 = arith.addf %22, %24 : vector<16x128xf32>
      %cst_24 = arith.constant 0.000000e+00 : f32
      %26 = vector.broadcast %cst_24 : f32 to vector<16x128xf32>
      %27 = arith.maximumf %25, %26 : vector<16x128xf32>
      %28 = arith.truncf %27 : vector<16x128xf32> to vector<16x128xbf16>
      %c0_25 = arith.constant 0 : index
      %c0_26 = arith.constant 0 : index
      %29 = vector.load %arg9[%c0_25, %c0_26] : memref<16x128xbf16, #tpu.memory_space<vmem>>, vector<16x128xbf16>
      tpu.vector_store %arg9[%c0_25, %c0_26], %28 {strides = array<i32>} : memref<16x128xbf16, #tpu.memory_space<vmem>>, vector<16x128xbf16>,
    } else {
    }
    return
  }
  func.func @transform_0(%arg0: i32, %arg1: i32) -> (i32, i32) {
    %c0_i32 = arith.constant 0 : i32
    return %arg0, %arg1 : i32, i32
  }
  func.func @transform_1(%arg0: i32, %arg1: i32) -> (i32, i32) {
    %c0_i32 = arith.constant 0 : i32
    %c0_i32_0 = arith.constant 0 : i32
    return %arg1, %c0_i32 : i32, i32
  }
  func.func @transform_2(%arg0: i32, %arg1: i32) -> (i32, i32) {
    %c0_i32 = arith.constant 0 : i32
    %c0_i32_0 = arith.constant 0 : i32
    return %arg0, %c0_i32 : i32, i32
  }
  func.func @transform_3(%arg0: i32, %arg1: i32) -> (i32, i32) {
    %c0_i32 = arith.constant 0 : i32
    %c0_i32_0 = arith.constant 0 : i32
    %c0_i32_1 = arith.constant 0 : i32
    return %c0_i32, %c0_i32_0 : i32, i32
  }
  func.func @transform_4(%arg0: i32, %arg1: i32) -> (i32, i32) {
    %c0_i32 = arith.constant 0 : i32
    %c0_i32_0 = arith.constant 0 : i32
    %c0_i32_1 = arith.constant 0 : i32
    return %c0_i32, %c0_i32_0 : i32, i32
  }
  func.func @transform_5(%arg0: i32, %arg1: i32) -> (i32, i32) {
    %c0_i32 = arith.constant 0 : i32
    %c0_i32_0 = arith.constant 0 : i32
    %c0_i32_1 = arith.constant 0 : i32
    return %c0_i32, %c0_i32_0 : i32, i32
  }
  func.func @transform_6(%arg0: i32, %arg1: i32) -> (i32, i32) {
    %c0_i32 = arith.constant 0 : i32
    %c0_i32_0 = arith.constant 0 : i32
    return %arg0, %c0_i32 : i32, i32
  }
  func.func @transform_7(%arg0: i32, %arg1: i32) -> (i32, i32) {
    %c0_i32 = arith.constant 0 : i32
    %c0_i32_0 = arith.constant 0 : i32
    return %arg0, %c0_i32 : i32, i32
  }
}

</mosaic_0001>

<bundles_post_ra>
// kernel: tpu_custom_call.1
= control target key start
LH: loop header
LB: loop body
LE: loop exit
PB: predicated region body
PF: predicated region fallthrough
CT: control target
= control target key end

     0   :  { %12 = vsyncpa [#allocation4], 0  ;;  %s885_s0 = inlined_call_operand.vmem [shape: bf16[16,128], index: 0, kind: input, shape index: {}]   ;;  %s886_s1 = inlined_call_operand.hbm [shape: bf16[128,128], index: 1, kind: input, shape index: {}]   ;;  %s887_s2 = inlined_call_operand.vmem [shape: bf16[16,128], index: 2, kind: input, shape index: {}]   ;;  %s888_s3 = inlined_call_operand.hbm [shape: bf16[128,128], index: 3, kind: input, shape index: {}]   ;;  %s889_s4 = inlined_call_operand.hbm [shape: bf16[128,128], index: 4, kind: input, shape index: {}]   ;;  %s890_s5 = inlined_call_operand.vmem [shape: f32[1,128], index: 5, kind: input, shape index: {}]   ;;  %s891_s6 = inlined_call_operand.vmem [shape: f32[16,1], index: 6, kind: input, shape index: {}]   ;;  %s892_s7 = inlined_call_operand.hbm [shape: bf16[16,128], index: 7, kind: output, shape index: {}]  }
   0x1   :  { %13 = vsyncpa [#allocation7], 0 }
   0x2   :  { %14 = vsyncpa [#allocation5], 0  ;;  %s724_s24 = smov [#allocation6]   ;;  %s725_s26 = smov [#allocation3]  }
   0x3   :  { %s36_s25 = sshll.u32 %s724_s24, 4  ;;  %s22_s27 = sshll.u32 %s725_s26, 4  ;;  %s37_s25 = int_to_ptr.vmem [resolvable:$true] %s36_s25  ;;  %s773_s27 = int_to_ptr.vmem [resolvable:$true] %s22_s27 }
   0x4   :  { %s630_s30 = scalar_lea.hbm %s888_s3, 1024 }
   0x5   :  { %p631_p0 = scmp.ne.s32.totalorder %s888_s3, %s630_s30  ;;  %p634_p1 = scmp.lt.u32.totalorder %s630_s30, %s888_s3 }
   0x7   :  { %p636_p2 = pnand %p634_p1, %p631_p0 }
   0x9   :  { %639 = shalt.err (!%p636_p2)
}
   0xa   :  { %s640_s12 = scalar_lea.vmem %s37_s25, 1024  ;;  %p645_p4 = scmp.lt.s32.totalorder %s37_s25, %s37_s25 }
   0xb   :  { %p641_p3 = scmp.ne.s32.totalorder %s37_s25, %s640_s12  ;;  %p646_p5 = scmp.lt.s32.totalorder %s640_s12, %s640_s12 }
   0xd   :  { %p647_p6 = por %p646_p5, %p645_p4 }
   0xf   :  { %p648_p7 = pnand %p647_p6, %p641_p3 }
  0x11   :  { %651 = shalt.err (!%p648_p7)
}
  0x12   :  { %s726_s13 = smov 64   ;;  %s727_s14 = smov 4  }
  0x13   :  { %42 = dma.hbm_to_vmem [thread:$0]  %s888_s3, 1024, %s37_s25, [#allocation7], %s726_s13, %s726_s13, %s727_s14  }
  0x14   :  { %s652_s19 = scalar_lea.hbm %s886_s1, 1024 }
  0x15   :  { %p653_p8 = scmp.ne.s32.totalorder %s886_s1, %s652_s19  ;;  %p656_p9 = scmp.lt.u32.totalorder %s652_s19, %s886_s1 }
  0x17   :  { %p658_p10 = pnand %p656_p9, %p653_p8 }
  0x19   :  { %661 = shalt.err (!%p658_p10)
}
  0x1a   :  { %s662_s24 = scalar_lea.vmem %s773_s27, 1024  ;;  %p667_p12 = scmp.lt.s32.totalorder %s773_s27, %s773_s27 }
  0x1b   :  { %p663_p11 = scmp.ne.s32.totalorder %s773_s27, %s662_s24  ;;  %p668_p13 = scmp.lt.s32.totalorder %s662_s24, %s662_s24 }
  0x1d   :  { %p669_p0 = por %p668_p13, %p667_p12 }
  0x1f   :  { %p670_p1 = pnand %p669_p0, %p663_p11 }
  0x21   :  { %673 = shalt.err (!%p670_p1)
}
  0x22   :  { %28 = dma.hbm_to_vmem [thread:$0]  %s886_s1, 1024, %s773_s27, [#allocation4], %s726_s13, %s726_s13, %s727_s14  }
  0x23   :  { %s728_s26 = smov [#allocation8]   ;;  %s674_s8 = scalar_lea.hbm %s889_s4, 1024 }
  0x24   :  { %s48_s28 = sshll.u32 %s728_s26, 4  ;;  %p675_p2 = scmp.ne.s32.totalorder %s889_s4, %s674_s8  ;;  %s49_s28 = int_to_ptr.vmem [resolvable:$true] %s48_s28 }
  0x25   :  { %p678_p3 = scmp.lt.u32.totalorder %s674_s8, %s889_s4 }
  0x27   :  { %p680_p4 = pnand %p678_p3, %p675_p2 }
  0x29   :  { %683 = shalt.err (!%p680_p4)
}
  0x2a   :  { %s684_s15 = scalar_lea.vmem %s49_s28, 1024  ;;  %p689_p6 = scmp.lt.s32.totalorder %s49_s28, %s49_s28 }
  0x2b   :  { %p685_p5 = scmp.ne.s32.totalorder %s49_s28, %s684_s15  ;;  %p690_p7 = scmp.lt.s32.totalorder %s684_s15, %s684_s15 }
  0x2d   :  { %p691_p8 = por %p690_p7, %p689_p6 }
  0x2f   :  { %p692_p9 = pnand %p691_p8, %p685_p5 }
  0x31   :  { %695 = shalt.err (!%p692_p9)
}
  0x32   :  { %54 = dma.hbm_to_vmem [thread:$0]  %s889_s4, 1024, %s49_s28, [#allocation7], %s726_s13, %s726_s13, %s727_s14  }
  0x33   :  { %718 = dma.done.wait [#allocation4], 1024  }
  0x34   :  { %719 = vsyncadd [#allocation4], 4294966272 }
  0x35   :  { %720 = dma.done.wait [#allocation7], 2048  }
  0x36   :  { %721 = vsyncadd [#allocation7], 4294965248  ;;  %v729_v0 = vmov 0.0   ;;  %vm730_vm0 = vmmov 0   ;;  %v731_v1 = vmov 0   ;;  %v604_v2 = vld [vmem:[#allocation3] sm:$0xff]  }
  0x37   :  { %534 = vmatprep.subr.bf16.mxu0 %v729_v0  ;;  %550 = vmatprep.mubr.msk.bf16.mxu0 %vm730_vm0, %v729_v0  ;;  %v605_v3 = vld [vmem:[#allocation3 + $0x8] sm:$0xff]   ;;  %v606_v4 = vld [vmem:[#allocation3 + $0x10] sm:$0xff]   ;;  %v607_v5 = vld [vmem:[#allocation3 + $0x18] sm:$0xff]   ;;  %s732_s22 = smov [#allocation9]  }
  0x38   :  { %603 = vset.pattern.permute.xlu0 %v731_v1  ;;  %554 = vmatprep.subr.bf16.mxu1 %v729_v0  ;;  %v199_v6 = vld [vmem:[%s891_s6] sm:$0xff]  ;;  %v200_v8 = vld [vmem:[%s891_s6 + $0x8] sm:$0xff]  ;;  %v617_v11 = vld [vmem:[#allocation8 + $0x10] sm:$0xff]   ;;  %s458_s23 = sshll.u32 %s732_s22, 4  ;;  %s459_s23 = int_to_ptr.vmem [resolvable:$true] %s458_s23 }
  0x39   :  { %570 = vmatprep.mubr.msk.bf16.mxu1 %vm730_vm0, %v729_v0  ;;  %535 = vmatpush3.bf16.msra.mxu0 %v604_v2  ;;  %v613_v7 = vld [vmem:[#allocation8] sm:$0xff]   ;;  %v615_v9 = vld [vmem:[#allocation8 + $0x8] sm:$0xff]   ;;  %v619_v13 = vld [vmem:[#allocation8 + $0x18] sm:$0xff]   ;;  %s696_s24 = scalar_lea.vmem %s459_s23, 128  ;;  %p701_p11 = scmp.lt.s32.totalorder %s459_s23, %s459_s23 }
  0x3a   :  { %536 = vmatprep.subr.bf16.mxu0 %v729_v0  ;;  %203 = vperm.xlu0 %603, %v199_v6   ;;  %v608_v10 = vld [vmem:[#allocation3 + $0x20] sm:$0xff]   ;;  %v609_v12 = vld [vmem:[#allocation3 + $0x28] sm:$0xff]   ;;  %v610_v14 = vld [vmem:[#allocation3 + $0x30] sm:$0xff]   ;;  %p697_p10 = scmp.ne.s32.totalorder %s459_s23, %s696_s24  ;;  %p702_p12 = scmp.lt.s32.totalorder %s696_s24, %s696_s24 }
  0x3b   :  { %555 = vmatpush3.bf16.msra.mxu1 %v613_v7  ;;  %v621_v15 = vld [vmem:[#allocation8 + $0x20] sm:$0xff]   ;;  %v611_v16 = vld [vmem:[#allocation3 + $0x38] sm:$0xff]   ;;  %v623_v17 = vld [vmem:[#allocation8 + $0x28] sm:$0xff]  }
  0x3c   :  { %556 = vmatprep.subr.bf16.mxu1 %v729_v0  ;;  %v612_v18 = vld [vmem:[%s885_s0] sm:$0xff]   ;;  %v625_v20 = vld [vmem:[#allocation8 + $0x30] sm:$0xff]   ;;  %v616_v21 = vld [vmem:[#allocation6 + $0x8] sm:$0xff]   ;;  %p703_p13 = por %p702_p12, %p701_p11 }
  0x3d   :  { %537 = vmatpush3.bf16.msra.mxu0 %v605_v3  ;;  %v614_v19 = vld [vmem:[#allocation6] sm:$0xff]   ;;  %v618_v22 = vld [vmem:[#allocation6 + $0x10] sm:$0xff]   ;;  %v620_v23 = vld [vmem:[#allocation6 + $0x18] sm:$0xff]  }
  0x3e   :  { %538 = vmatprep.subr.bf16.mxu0 %v729_v0  ;;  %208 = vperm.xlu0 %603, %v200_v8   ;;  %v622_v24 = vld [vmem:[#allocation6 + $0x20] sm:$0xff]   ;;  %v624_v25 = vld [vmem:[#allocation6 + $0x28] sm:$0xff]   ;;  %v626_v26 = vld [vmem:[#allocation6 + $0x30] sm:$0xff]   ;;  %p704_p0 = pnand %p703_p13, %p697_p10 }
  0x3f   :  { %557 = vmatpush3.bf16.msra.mxu1 %v615_v9  ;;  %v627_v27 = vld [vmem:[#allocation8 + $0x38] sm:$0xff]   ;;  %v628_v28 = vld [vmem:[%s887_s2] sm:$0xff]  }
  0x40   :  { %558 = vmatprep.subr.bf16.mxu1 %v729_v0  ;;  %v629_v29 = vld [vmem:[#allocation6 + $0x38] sm:$0xff]   ;;  %v497_v44 = vld [vmem:[%s890_s5] ss:$0 sm:$0xff] }
  0x41   :  { %539 = vmatpush3.bf16.msra.mxu0 %v606_v4 }
  0x42   :  { %540 = vmatprep.subr.bf16.mxu0 %v729_v0 }
  0x43   :  { %559 = vmatpush3.bf16.msra.mxu1 %v617_v11 }
  0x44   :  { %560 = vmatprep.subr.bf16.mxu1 %v729_v0 }
  0x45   :  { %541 = vmatpush3.bf16.msra.mxu0 %v607_v5 }
  0x46   :  { %542 = vmatprep.subr.bf16.mxu0 %v729_v0 }
  0x47   :  { %561 = vmatpush3.bf16.msra.mxu1 %v619_v13 }
  0x48   :  { %562 = vmatprep.subr.bf16.mxu1 %v729_v0 }
  0x49   :  { %543 = vmatpush3.bf16.msra.mxu0 %v608_v10 }
  0x4a   :  { %544 = vmatprep.subr.bf16.mxu0 %v729_v0 }
  0x4b   :  { %563 = vmatpush3.bf16.msra.mxu1 %v621_v15 }
  0x4c   :  { %564 = vmatprep.subr.bf16.mxu1 %v729_v0 }
  0x4d   :  { %545 = vmatpush3.bf16.msra.mxu0 %v609_v12 }
  0x4e   :  { %546 = vmatprep.subr.bf16.mxu0 %v729_v0 }
  0x4f   :  { %565 = vmatpush3.bf16.msra.mxu1 %v623_v17 }
  0x50   :  { %566 = vmatprep.subr.bf16.mxu1 %v729_v0 }
  0x51   :  { %547 = vmatpush3.bf16.msra.mxu0 %v610_v14 }
  0x52   :  { %548 = vmatprep.subr.bf16.mxu0 %v729_v0 }
  0x53   :  { %567 = vmatpush3.bf16.msra.mxu1 %v625_v20 }
  0x54   :  { %568 = vmatprep.subr.bf16.mxu1 %v729_v0 }
  0x55   :  { %549 = vmatpush3.bf16.msra.mxu0 %v611_v16 }
  0x56   :  { %574 = vmatprep.subr.bf16.mxu0 %v729_v0 }
  0x57   :  { %569 = vmatpush3.bf16.msra.mxu1 %v627_v27 }
  0x58   :  { %551 = vmatmul.mubr.bf16.vlgmr.msra.gmra.mrb[0].mxu0 %v612_v18 }
  0x59   :  { %575 = vmatpush3.bf16.msra.mxu0 %v614_v19  ;;  %590 = vmatprep.mubr.msk.bf16.mxu0 %vm730_vm0, %v729_v0 }
  0x5a   :  { %576 = vmatprep.subr.bf16.mxu0 %v729_v0  ;;  %571 = vmatmul.mubr.bf16.vlgmr.msra.gmra.mrb[0].mxu1 %v628_v28 }
  0x5d   :  { %577 = vmatpush3.bf16.msra.mxu0 %v616_v21 }
  0x5e   :  { %578 = vmatprep.subr.bf16.mxu0 %v729_v0 }
  0x61   :  { %579 = vmatpush3.bf16.msra.mxu0 %v618_v22 }
  0x62   :  { %580 = vmatprep.subr.bf16.mxu0 %v729_v0 }
  0x65   :  { %581 = vmatpush3.bf16.msra.mxu0 %v620_v23 }
  0x66   :  { %582 = vmatprep.subr.bf16.mxu0 %v729_v0 }
  0x69   :  { %583 = vmatpush3.bf16.msra.mxu0 %v622_v24 }
  0x6a   :  { %584 = vmatprep.subr.bf16.mxu0 %v729_v0 }
  0x6d   :  { %585 = vmatpush3.bf16.msra.mxu0 %v624_v25 }
  0x6e   :  { %586 = vmatprep.subr.bf16.mxu0 %v729_v0 }
  0x71   :  { %587 = vmatpush3.bf16.msra.mxu0 %v626_v26 }
  0x72   :  { %588 = vmatprep.subr.bf16.mxu0 %v729_v0 }
  0x75   :  { %589 = vmatpush3.bf16.msra.mxu0 %v629_v29 }
  0xb9   :  { %v204_v30 = vpop.permute.xlu0 %203 }
  0xbd   :  { %v209_v33 = vpop.permute.xlu0 %208 }
 0x12b   :  { %v183_v31 = vpop.f32.mrb[0].mxu0 }
 0x12c   :  { %v552_v32 = vpop.f32.mrb[1].mxu0  ;;  %v211_v35 = vmul.f32 %v204_v30, %v183_v31 }
 0x12d   :  { %v186_v34 = vpop.f32.mrb[2].mxu0  ;;  %v336_v39 = vpop.f32.mrb[0].mxu1 }
 0x12e   :  { %v212_v36 = vmul.f32 %v209_v33, %v186_v34  ;;  %v553_v37 = vpop.f32.mrb[3].mxu0  ;;  %v572_v40 = vpop.f32.mrb[1].mxu1 }
 0x12f   :  { %v339_v41 = vpop.f32.mrb[2].mxu1 }
 0x130   :  { %v213_v38 = vpack.c.bf16 %v212_v36, %v211_v35  ;;  %v573_v42 = vpop.f32.mrb[3].mxu1 }
 0x132   :  { %591 = vmatmul.mubr.bf16.vlgmr.msra.gmra.mrb[4].mxu0 %v213_v38 }
 0x205   :  { %v425_v43 = vpop.f32.mrb[4].mxu0 }
 0x206   :  { %v426_v45 = vadd.f32 %v425_v43, %v336_v39  ;;  %v592_v46 = vpop.f32.mrb[5].mxu0 }
 0x207   :  { %v428_v47 = vpop.f32.mrb[6].mxu0 }
 0x208   :  { %v439_v48 = vadd.f32 %v497_v44, %v426_v45  ;;  %v429_v49 = vadd.f32 %v428_v47, %v339_v41  ;;  %v593_v50 = vpop.f32.mrb[7].mxu0 }
 0x20a   :  { %v440_v51 = vadd.f32 %v497_v44, %v429_v49  ;;  %v441_v52 = vmax.f32 %v439_v48, 0.0 }
 0x20c   :  { %v442_v53 = vmax.f32 %v440_v51, 0.0 }
 0x20e   :  { %v505_v54 = vpack.c.bf16 %v442_v53, %v441_v52 }
 0x210   :  { %506 = vst [vmem:[#allocation9] sm:$0xff] %v505_v54  }
 0x211   :  { %707 = shalt.err (!%p704_p0)
}
 0x212   :  { %s708_s25 = scalar_lea.hbm %s892_s7, 128 }
 0x213   :  { %p709_p1 = scmp.ne.s32.totalorder %s892_s7, %s708_s25  ;;  %p712_p2 = scmp.lt.u32.totalorder %s708_s25, %s892_s7 }
 0x215   :  { %p714_p3 = pnand %p712_p2, %p709_p1 }
 0x217   :  { %717 = shalt.err (!%p714_p3)
}
 0x218   :  { %464 = dma.vmem_to_hbm [thread:$0]  %s459_s23, 128, %s892_s7, [#allocation5], %s726_s13, %s726_s13, %s727_s14  }
 0x219   :  { %722 = dma.done.wait [#allocation5], 128  }
 0x21a   :  { %723 = vsyncadd [#allocation5], 4294967168 }
 0x21b   :  { %468 = vsyncpa [#allocation4], 1 }
 0x21c   :  { %469 = vsyncpa [#allocation7], 1 }
 0x21d   :  { %470 = vsyncpa [#allocation5], 1 }

</bundles_post_ra>
